<compile_context>
chip_gen: v7x
topology: tpu7x:2x2x1
jax: 0.10.0
libtpu: 0.0.40
codegen_flags: <defaults>
</compile_context>

<pallas_src>
import jax
import jax.numpy as jnp
from jax.experimental import pallas as pl
from jax.experimental.pallas import tpu as pltpu

SQRT1_2 = 0.7071067811865476
TARGET_BLOCK_BYTES = 2 << 20          # ~2 MB blocks: >=85% of HBM roofline on all gens


def _default_vmem_limit():
    # Generation-aware scoped VMEM: ~3/4 of physical, capped at 96 MB.
    # v7x (64 MiB) -> 48 MB, v5e/v6e (128 MiB) -> 96 MB, unknown -> conservative 32 MB.
    try:
        cap = int(pltpu.get_tpu_info().vmem_capacity_bytes)
        return min((cap * 3) // 4, 96 * 1024 * 1024)
    except Exception:
        return 32 * 1024 * 1024


VMEM_LIMIT = _default_vmem_limit()


# ----------------------------------------------------------------------------- helpers
def _cdiv(a, b):
    return -(-a // b)


def _round_up(x, m):
    return ((x + m - 1) // m) * m


def _erf_approx(x):
    # Abramowitz & Stegun 7.1.26 (|abs err| < 1.5e-7): matches exact (erf-based) GELU
    # within float32 tolerance using only ops guaranteed to lower in Mosaic.
    a1, a2, a3, a4, a5 = 0.254829592, -0.284496736, 1.421413741, -1.453152027, 1.061405429
    p = 0.3275911
    sgn = jnp.where(x >= 0.0, 1.0, -1.0)
    ax = jnp.abs(x)
    t = 1.0 / (1.0 + p * ax)
    poly = ((((a5 * t + a4) * t + a3) * t + a2) * t + a1) * t
    return sgn * (1.0 - poly * jnp.exp(-ax * ax))


def _gelu(x):
    # nn.GELU() default (approximate='none'), i.e. 0.5*x*(1+erf(x/sqrt(2)))
    return 0.5 * x * (1.0 + _erf_approx(x * SQRT1_2))


def _tile_1d(total, bytes_per_unit, target_bytes, align):
    """Pick (padded_total, tile) for a 1-D grid axis.

    tile is a multiple of `align`, padded_total is a multiple of tile, the block is
    ~target_bytes, >=2 (even) steps when the extent allows (feeds v7x's dual TCs),
    and a divisor of the (aligned) extent is preferred so no host-side pad is needed.
    """
    total_pad = _round_up(max(total, align), align)
    want = max(align, (target_bytes // max(bytes_per_unit, 1)) // align * align)
    if want >= total_pad:
        # One block would cover everything; split into two even halves when big enough.
        if total_pad >= 2 * align:
            half = _round_up(_cdiv(total_pad, 2), align)
            return 2 * half, half
        return total_pad, total_pad
    # Prefer a tile that exactly divides the (aligned) extent: zero pad traffic.
    best = None
    t = want
    while t >= align:
        if total_pad % t == 0:
            best = t
            break
        t -= align
    if best is not None and best * 16 >= want:
        return total_pad, best
    # Fall back: pad up to a multiple of the target tile (waste < one tile).
    n = _cdiv(total_pad, want)
    if n % 2 == 1:
        n += 1
    return n * want, want


def _pick_hw_tile(hw, target=2048):
    """Largest multiple of 128 that divides hw and is <= target; full hw otherwise."""
    if hw % 128 != 0 or hw <= target:
        return hw
    t = (target // 128) * 128
    while t >= 128:
        if hw % t == 0:
            return t
        t -= 128
    return hw


# ----------------------------------------------------------------------------- kernel 1
# (image/255 - mean)/std  ==  image * (1/(255*std)) + (-mean/std)
# Layout: NCHW kept as-is (no HBM transpose); rows = b*T*c, lanes = h*w tiles.
# Input is read in its native dtype and cast in-kernel (uint8 inputs would cut HBM 4x).
def _normalize_kernel(x_ref, scale_ref, bias_ref, o_ref):
    o_ref[...] = x_ref[...].astype(jnp.float32) * scale_ref[...] + bias_ref[...]


def normalize_image(img, mean, std):
    """img: [b, T, 3, h, w] with values in [0, 255]. Returns normalized float32 image."""
    b, T, c, h, w = img.shape
    R = b * T * c
    L = h * w
    x = img.reshape(R, L)                                   # free reshape, native dtype
    L_pad, lane_tile = _tile_1d(L, R * 4, TARGET_BLOCK_BYTES, 128)
    if L_pad != L:
        x = jnp.pad(x, ((0, 0), (0, L_pad - L)))

    scale_c = (1.0 / (255.0 * std)).astype(jnp.float32)     # per-channel
    bias_c = (-mean / std).astype(jnp.float32)
    scale = jnp.broadcast_to(scale_c[None, :], (b * T, c)).reshape(R, 1)
    bias = jnp.broadcast_to(bias_c[None, :], (b * T, c)).reshape(R, 1)

    out = pl.pallas_call(
        _normalize_kernel,
        out_shape=jax.ShapeDtypeStruct((R, L_pad), jnp.float32),
        grid=(L_pad // lane_tile,),
        in_specs=[
            pl.BlockSpec((R, lane_tile), lambda i: (0, i)),
            pl.BlockSpec((R, 1), lambda i: (0, 0)),
            pl.BlockSpec((R, 1), lambda i: (0, 0)),
        ],
        out_specs=pl.BlockSpec((R, lane_tile), lambda i: (0, i)),
        compiler_params=pltpu.CompilerParams(
            dimension_semantics=("parallel",), vmem_limit_bytes=VMEM_LIMIT),
    )(x, scale, bias)
    if L_pad != L:
        out = out[:, :L]
    return out.reshape(b, T, c, h, w)


# ----------------------------------------------------------------------------- kernel 2
# net = tanh(context), inp = relu(context); pure elementwise, lane-dense tiled slab.
def _ctx_act_kernel(x_ref, net_ref, inp_ref):
    x = x_ref[...]
    net_ref[...] = jnp.tanh(x)
    inp_ref[...] = jnp.maximum(x, 0.0)


def context_activations(context, lane=512):
    """context: [N, C, H, W] -> (tanh(context), relu(context))."""
    N, C, H, W = context.shape
    total = N * C * H * W
    rows = _cdiv(total, lane)
    rows_pad, row_tile = _tile_1d(rows, lane * 4, TARGET_BLOCK_BYTES, 8)
    total_pad = rows_pad * lane

    x = context.reshape(-1)
    if total_pad != total:
        x = jnp.pad(x, (0, total_pad - total))
    x = x.reshape(rows_pad, lane)

    net, inp = pl.pallas_call(
        _ctx_act_kernel,
        out_shape=(jax.ShapeDtypeStruct((rows_pad, lane), jnp.float32),
                   jax.ShapeDtypeStruct((rows_pad, lane), jnp.float32)),
        grid=(rows_pad // row_tile,),
        in_specs=[pl.BlockSpec((row_tile, lane), lambda i: (i, 0))],
        out_specs=(pl.BlockSpec((row_tile, lane), lambda i: (i, 0)),
                   pl.BlockSpec((row_tile, lane), lambda i: (i, 0))),
        compiler_params=pltpu.CompilerParams(
            dimension_semantics=("parallel",), vmem_limit_bytes=VMEM_LIMIT),
    )(x)
    net = net.reshape(-1)[:total].reshape(N, C, H, W)
    inp = inp.reshape(-1)[:total].reshape(N, C, H, W)
    return net, inp


# ----------------------------------------------------------------------------- kernel 3
# corr_mlp = Mlp(in=4*9*9, hidden=256, out=128): Linear -> GELU -> Linear.
# NCHW is kept end-to-end: the kernel contracts over the (full) channel dim of an
# (Cin, hw_tile) block — hidden = w1ᵀ·x, out = w2ᵀ·gelu(hidden) — so there is no
# host-side transpose/pad/cast pass; bf16 operands, f32 MXU accumulation.
def _corr_mlp_kernel(x_ref, w1t_ref, b1_ref, w2t_ref, b2_ref, o_ref):
    x = x_ref[0].astype(jnp.bfloat16)                       # [Cin, hw], cast in-kernel
    h = jnp.dot(w1t_ref[...], x, preferred_element_type=jnp.float32) + b1_ref[...]
    h = _gelu(h).astype(jnp.bfloat16)                       # [hid, hw]
    o_ref[0] = jnp.dot(w2t_ref[...], h, preferred_element_type=jnp.float32) + b2_ref[...]


def corr_mlp_apply(out_corrs, params, hw_target=2048):
    """out_corrs: [N, C_in, H, W] (NCHW) -> [N, 128, H, W]."""
    N, Cin, H, W = out_corrs.shape
    HW = H * W
    hid = params["w1"].shape[1]
    cout = params["w2"].shape[1]

    # Tiny one-time weight prep (0.3 MB total): transposed + bf16.
    w1t = params["w1"].T.astype(jnp.bfloat16)                # [hid, Cin]
    w2t = params["w2"].T.astype(jnp.bfloat16)                # [cout, hid]
    b1 = params["b1"].reshape(hid, 1).astype(jnp.float32)
    b2 = params["b2"].reshape(cout, 1).astype(jnp.float32)

    x = out_corrs.reshape(N, Cin, HW)                        # free reshape, stays NCHW
    hw_tile = _pick_hw_tile(HW, hw_target)

    y = pl.pallas_call(
        _corr_mlp_kernel,
        out_shape=jax.ShapeDtypeStruct((N, cout, HW), jnp.float32),
        grid=(N, HW // hw_tile),
        in_specs=[
            pl.BlockSpec((1, Cin, hw_tile), lambda n, j: (n, 0, j)),
            pl.BlockSpec((hid, Cin), lambda n, j: (0, 0)),
            pl.BlockSpec((hid, 1), lambda n, j: (0, 0)),
            pl.BlockSpec((cout, hid), lambda n, j: (0, 0)),
            pl.BlockSpec((cout, 1), lambda n, j: (0, 0)),
        ],
        out_specs=pl.BlockSpec((1, cout, hw_tile), lambda n, j: (n, 0, j)),
        compiler_params=pltpu.CompilerParams(
            dimension_semantics=("parallel", "parallel"),
            vmem_limit_bytes=VMEM_LIMIT),
    )(x, w1t, b1, w2t, b2)
    return y.reshape(N, cout, H, W)


# ----------------------------------------------------------------------------- kernel 4
# convex_upsample_3D: softmax over the 27 (3x3x3) taps + weighted sum of the unfolded
# (rate*flow).  The 9 (T,H) shifts are pre-gathered on the host (cheap: flow has only 2
# channels); the 3 W shifts are static lane slices in-kernel.  The softmax is fused into
# the tap loop (running exp-sum), and the final normalization uses an exact EUP
# reciprocal — no [27, rr, th, W] temporaries are materialized.
def _convex_up_kernel(mask_ref, flow_ref, o_ref):
    Wd = o_ref.shape[-1]

    # running max over the 27 taps (per pixel, per (r1,r2) cell)
    m_max = mask_ref[0, 0]
    for k in range(1, 27):
        m_max = jnp.maximum(m_max, mask_ref[0, k])

    acc = jnp.zeros(o_ref.shape[1:], jnp.float32)            # [2, rr, th, W]
    den = jnp.zeros(m_max.shape, jnp.float32)                # [rr, th, W]
    k = 0
    for kt in range(3):
        for kh in range(3):
            tap = flow_ref[0, :, kt * 3 + kh, :, :]          # [2, th, W+2]
            for kw in range(3):
                e = jnp.exp(mask_ref[0, k] - m_max)          # [rr, th, W]
                den = den + e
                acc = acc + e[None] * tap[:, None, :, kw:kw + Wd]
                k += 1
    # Exact reciprocal (keeps 1e-4 tolerance); on v7x this moves the divide to the EUP.
    o_ref[0] = acc * pl.reciprocal(den)[None]


def convex_upsample_3d(flow, mask, b, T, rate=4):
    """flow: [(b t), 2, H, W], mask: [(b t), 27*rate*rate, H, W] -> [(b t), 2, rate*H, rate*W]."""
    BT, _, H, W = flow.shape
    rr = rate * rate
    flow5 = flow.reshape(b, T, 2, H, W)
    mask6 = mask.reshape(BT, 27, rr, H, W)        # channel dim is 27-major, then (rate, rate)

    # Pad (T, H, W) by 1 and pre-gather the 9 (T,H) shifts; keep W padded (W+2)
    # so the kernel can take the 3 W shifts as static lane slices.
    fp = jnp.pad(rate * flow5, ((0, 0), (1, 1), (0, 0), (1, 1), (1, 1)))  # [b,T+2,2,H+2,W+2]
    taps = [fp[:, kt:kt + T, :, kh:kh + H, :] for kt in range(3) for kh in range(3)]
    flow9 = jnp.stack(taps, axis=3).reshape(BT, 2, 9, H, W + 2)           # [(b t),2,9,H,W+2]

    # VMEM-budget-aware H tiling: mask block <= VMEM_LIMIT/12 (~4 MB on v7x, ~8 MB v5e/v6e).
    mask_budget = max(2 << 20, VMEM_LIMIT // 12)

    def mask_block_bytes(t):
        return 27 * rr * t * W * 4

    if H % 8 == 0:
        th = 8
        for cand in range(H, 7, -8):
            if H % cand == 0 and mask_block_bytes(cand) <= mask_budget:
                th = cand
                break
        # Keep >=2 grid steps when possible so v7x's second TensorCore has work.
        if BT * (H // th) < 2 and H >= 16 and (H // 2) % 8 == 0:
            th = H // 2
    else:
        th = H                       # (8,128) rule: block must equal the full dim

    up = pl.pallas_call(
        _convex_up_kernel,
        out_shape=jax.ShapeDtypeStruct((BT, 2, rr, H, W), jnp.float32),
        grid=(BT, H // th),
        in_specs=[
            pl.BlockSpec((1, 27, rr, th, W), lambda n, hi: (n, 0, 0, hi, 0)),
            pl.BlockSpec((1, 2, 9, th, W + 2), lambda n, hi: (n, 0, 0, hi, 0)),
        ],
        out_specs=pl.BlockSpec((1, 2, rr, th, W), lambda n, hi: (n, 0, 0, hi, 0)),
        compiler_params=pltpu.CompilerParams(
            dimension_semantics=("parallel", "parallel"),
            vmem_limit_bytes=VMEM_LIMIT),
    )(mask6, flow9)

    up = up.reshape(b, T, 2, rate, rate, H, W)
    up = up.transpose(0, 1, 2, 5, 3, 6, 4)                 # [b, T, 2, H, r1, W, r2]
    return up.reshape(b * T, 2, rate * H, rate * W)


# ----------------------------------------------------------------------------- references (pure JAX)
def _ref_corr_mlp(out_corrs, params):
    # Mirrors the kernel's mixed precision (bf16 operands, f32 accumulation),
    # in the module's channels-last formulation.
    x = out_corrs.transpose(0, 2, 3, 1).astype(jnp.bfloat16)
    w1 = params["w1"].astype(jnp.bfloat16)
    w2 = params["w2"].astype(jnp.bfloat16)
    h = jnp.dot(x, w1, preferred_element_type=jnp.float32) + params["b1"]
    h = _gelu(h).astype(jnp.bfloat16)
    y = jnp.dot(h, w2, preferred_element_type=jnp.float32) + params["b2"]
    return y.transpose(0, 3, 1, 2)


def _ref_convex_upsample_3d(flow, mask, b, T, rate=4):
    BT, _, H, W = flow.shape
    flow5 = flow.reshape(b, T, 2, H, W).transpose(0, 2, 1, 3, 4)
    mask5 = mask.reshape(b, T, 27 * rate * rate, H, W).transpose(0, 2, 1, 3, 4)
    m = jax.nn.softmax(mask5.reshape(b, 1, 27, 1, rate, rate, T, H, W), axis=2)
    fp = jnp.pad(rate * flow5, ((0, 0), (0, 0), (1, 1), (1, 1), (1, 1)))
    taps = [fp[:, :, kt:kt + T, kh:kh + H, kw:kw + W]
            for kt in range(3) for kh in range(3) for kw in range(3)]
    f27 = jnp.stack(taps, axis=2).reshape(b, 2, 27, 1, 1, 1, T, H, W)
    up = jnp.sum(m * f27, axis=2)                          # [b,2,1,r,r,T,H,W]
    up = up.transpose(0, 1, 5, 2, 6, 3, 7, 4).reshape(b, 2, T, rate * H, rate * W)
    return up.transpose(0, 2, 1, 3, 4).reshape(b * T, 2, rate * H, rate * W)


# ----------------------------------------------------------------------------- model wrapper
class StereoAnyVideoPallas:
    """Pallas implementation of StereoAnyVideo's kernel-level compute."""

    def __init__(self, key):
        self.hidden_dim = 128
        self.context_dim = 128
        cin, hid, cout = 4 * 9 * 9, 256, 128          # corr_mlp: Mlp(324, 256, 128)
        k1, k2, k3, k4 = jax.random.split(key, 4)
        self.params = {
            "w1": jax.random.normal(k1, (cin, hid), jnp.float32) / jnp.sqrt(cin),
            "b1": 0.01 * jax.random.normal(k2, (hid,), jnp.float32),
            "w2": jax.random.normal(k3, (hid, cout), jnp.float32) / jnp.sqrt(hid),
            "b2": 0.01 * jax.random.normal(k4, (cout,), jnp.float32),
        }

    def corr_mlp(self, out_corrs):
        return corr_mlp_apply(out_corrs, self.params)

    def zero_init(self, fmap):
        N, C, H, W = fmap.shape
        return jnp.zeros((N, 2, H, W), jnp.float32)

    def convex_upsample_3D(self, flow, mask, b, T, rate=4):
        return convex_upsample_3d(flow, mask, b, T, rate)


# ----------------------------------------------------------------------------- demo / checks
if __name__ == "__main__":
    key = jax.random.PRNGKey(0)
    k = jax.random.split(key, 8)

    b, T, c, h, w = 1, 2, 3, 32, 32          # image1/image2: [b, T, 3, h, w]
    H, W = h // 4, w // 4                    # 1/4-resolution feature maps
    N = b * T

    image1 = jax.random.uniform(k[0], (b, T, c, h, w), jnp.float32, 0.0, 255.0)
    image2 = jax.random.uniform(k[1], (b, T, c, h, w), jnp.float32, 0.0, 255.0)

    model = StereoAnyVideoPallas(key=k[2])

    # --- image normalization (Pallas, NCHW layout, ~2 MB lane tiles) ---
    mean = jnp.array([0.485, 0.456, 0.406], jnp.float32)
    std = jnp.array([0.229, 0.224, 0.225], jnp.float32)
    img1_n = normalize_image(image1, mean, std)
    img2_n = normalize_image(image2, mean, std)
    ref_n = (image1 / 255.0 - mean.reshape(1, 1, 3, 1, 1)) / std.reshape(1, 1, 3, 1, 1)
    assert jnp.allclose(img1_n, ref_n, atol=1e-4), "normalization mismatch"

    # TODO(synk): stand-in feature tensors replace the (unprovided) BasicEncoder /
    # DepthExtractor / AAPC / SequenceUpdateBlock3D outputs that feed these kernels.
    context = jax.random.normal(k[3], (N, 128, H, W), jnp.float32)
    out_corrs_raw = jax.random.normal(k[4], (N, 4 * 9 * 9, H, W), jnp.float32)
    up_mask = jax.random.normal(k[5], (N, 27 * 16, H, W), jnp.float32)
    delta_flow = 0.5 * jax.random.normal(k[6], (N, 2, H, W), jnp.float32)

    # --- net = tanh(context), inp = relu(context) (Pallas, tiled elementwise) ---
    net, inp = context_activations(context)
    assert jnp.allclose(net, jnp.tanh(context), atol=1e-4)
    assert jnp.allclose(inp, jnp.maximum(context, 0.0), atol=1e-4)

    # --- corr_mlp: Linear(324->256) -> GELU -> Linear(256->128) (Pallas MXU, NCHW, bf16) ---
    corr_feat = model.corr_mlp(out_corrs_raw)
    corr_ref = _ref_corr_mlp(out_corrs_raw, model.params)
    assert corr_feat.shape == (N, 128, H, W)
    assert jnp.allclose(corr_feat, corr_ref, atol=2e-2, rtol=2e-2), "corr_mlp mismatch"

    # --- flow update + 3D convex upsampling (Pallas fused-softmax tap accumulation) ---
    flow = model.zero_init(context) + delta_flow          # mimics flow = flow + delta_flow
    flow_up = model.convex_upsample_3D(flow, up_mask, b, T, rate=4)
    up_ref = _ref_convex_upsample_3d(flow, up_mask, b, T, rate=4)
    assert flow_up.shape == (N, 2, 4 * H, 4 * W)
    assert jnp.allclose(flow_up, up_ref, atol=1e-4, rtol=1e-4), "convex_upsample_3D mismatch"

    # --- assemble predictions like the PyTorch forward: 'd (b t) c h w -> d t b c h w' ---
    # TODO(synk): the intermediate-scale bilinear F.interpolate of flow_up is not re-implemented.
    flow_predictions = [flow_up[:, :1]]
    predictions = jnp.stack(flow_predictions)
    d = predictions.shape[0]
    predictions = predictions.reshape(d, b, T, 1, 4 * H, 4 * W).transpose(0, 2, 1, 3, 4, 5)

    jax.block_until_ready((img1_n, img2_n, net, inp, corr_feat, predictions))
    print("KERNEL_OK")
</pallas_src>

<mosaic_0001>
module attributes {stable_mosaic.version = 11 : i64} {
  func.func @_normalize_kernel(%arg0: i32, %arg1: memref<6x512xf32, #tpu.memory_space<vmem>>, %arg2: memref<6x1xf32, #tpu.memory_space<vmem>>, %arg3: memref<6x1xf32, #tpu.memory_space<vmem>>, %arg4: memref<6x512xf32, #tpu.memory_space<vmem>>) attributes {dimension_semantics = [#tpu.dimension_semantics<parallel>], iteration_bounds = array<i64: 2>, scalar_prefetch = 0 : i64, scratch_operands = 0 : i64, tpu.core_type = #tpu.core_type<tc>, window_params = [{transform_indices = @transform_0, window_bounds = array<i64: 6, 512>}, {pipeline_mode = #tpu.pipeline_mode<synchronous>, transform_indices = @transform_1, window_bounds = array<i64: 6, 1>}, {pipeline_mode = #tpu.pipeline_mode<synchronous>, transform_indices = @transform_2, window_bounds = array<i64: 6, 1>}, {transform_indices = @transform_3, window_bounds = array<i64: 6, 512>}]} {
    %c0 = arith.constant 0 : index
    %c0_0 = arith.constant 0 : index
    %0 = vector.load %arg1[%c0, %c0_0] : memref<6x512xf32, #tpu.memory_space<vmem>>, vector<6x512xf32>
    %c0_1 = arith.constant 0 : index
    %c0_2 = arith.constant 0 : index
    %1 = vector.load %arg2[%c0_1, %c0_2] : memref<6x1xf32, #tpu.memory_space<vmem>>, vector<6x1xf32>
    %2 = vector.broadcast %1 : vector<6x1xf32> to vector<6x512xf32>
    %3 = arith.mulf %0, %2 : vector<6x512xf32>
    %c0_3 = arith.constant 0 : index
    %c0_4 = arith.constant 0 : index
    %4 = vector.load %arg3[%c0_3, %c0_4] : memref<6x1xf32, #tpu.memory_space<vmem>>, vector<6x1xf32>
    %5 = vector.broadcast %4 : vector<6x1xf32> to vector<6x512xf32>
    %6 = arith.addf %3, %5 : vector<6x512xf32>
    %c0_5 = arith.constant 0 : index
    %c0_6 = arith.constant 0 : index
    %7 = vector.load %arg4[%c0_5, %c0_6] : memref<6x512xf32, #tpu.memory_space<vmem>>, vector<6x512xf32>
    tpu.vector_store %arg4[%c0_5, %c0_6], %6 {strides = array<i32>} : memref<6x512xf32, #tpu.memory_space<vmem>>, vector<6x512xf32>,
    return
  }
  func.func @transform_0(%arg0: i32) -> (i32, i32) {
    %c0_i32 = arith.constant 0 : i32
    %c0_i32_0 = arith.constant 0 : i32
    return %c0_i32, %arg0 : i32, i32
  }
  func.func @transform_1(%arg0: i32) -> (i32, i32) {
    %c0_i32 = arith.constant 0 : i32
    %c0_i32_0 = arith.constant 0 : i32
    %c0_i32_1 = arith.constant 0 : i32
    return %c0_i32, %c0_i32_0 : i32, i32
  }
  func.func @transform_2(%arg0: i32) -> (i32, i32) {
    %c0_i32 = arith.constant 0 : i32
    %c0_i32_0 = arith.constant 0 : i32
    %c0_i32_1 = arith.constant 0 : i32
    return %c0_i32, %c0_i32_0 : i32, i32
  }
  func.func @transform_3(%arg0: i32) -> (i32, i32) {
    %c0_i32 = arith.constant 0 : i32
    %c0_i32_0 = arith.constant 0 : i32
    return %c0_i32, %arg0 : i32, i32
  }
}

</mosaic_0001>

<bundles_post_ra>
// kernel: tpu_custom_call.1
= control target key start
LH: loop header
LB: loop body
LE: loop exit
PB: predicated region body
PF: predicated region fallthrough
CT: control target
= control target key end

     0   :  { %8 = vsyncpa [#allocation3], 0  ;;  %s654_s0 = inlined_call_operand.hbm [shape: f32[6,1024], index: 0, kind: input, shape index: {}]   ;;  %s655_s1 = inlined_call_operand.vmem [shape: f32[6,1], index: 1, kind: input, shape index: {}]   ;;  %s656_s2 = inlined_call_operand.vmem [shape: f32[6,1], index: 2, kind: input, shape index: {}]   ;;  %s657_s3 = inlined_call_operand.hbm [shape: f32[6,1024], index: 3, kind: output, shape index: {}]  }
   0x1   :  { %10 = vsyncpa [#allocation3 + $0x1], 0 }
   0x2   :  { %11 = vsyncpa [#allocation4], 0 }
   0x3   :  { %13 = vsyncpa [#allocation4 + $0x1], 0  ;;  %s487_s12 = smov 0   ;;  %s489_s13 = smov 0  }
   0x4   :  { %s491_s14 = smov 0   ;;  %s493_s15 = smov 0  }
   0x5 LB: > { %s508_s16 = sadd.s32 4294967295, %s462_s15   ;;  %s302_s17 = sadd.s32 4294967294, %s462_s15   ;;  %s462_s15 = sphi %s493_s15, %s672_s15   ;;  %s458_s14 = sphi %s491_s14, %s671_s14   ;;  %s454_s13 = sphi %s489_s13, %s670_s13   ;;  %s450_s12 = sphi %s487_s12, %s669_s12  }
   0x6   : > { %s512_s18 = sadd.s32 1, %s462_s15   ;;  %s26_s19 = sadd.s32 1, %s458_s14 }
   0x7   : > { %s23_s20 = ssub.s32 %s462_s15, %s512_s18  ;;  %p33_p0 = scmp.ne.s32.totalorder %s458_s14, %s454_s13 }
   0x8   : > { %p24_p1 = scmp.eq.s32.totalorder %s23_s20, 0  ;;  %p34_p2 = scmp.eq.s32.totalorder %s462_s15, 0 }
   0x9   : > { %p39_p3 = scmp.ne.s32.totalorder %s454_s13, %s450_s12  ;;  %p40_p4 = scmp.eq.s32.totalorder %s508_s16, 0 }
   0xa   : > { %s524_s21 = scalar_select %p24_p1, %s458_s14, %s26_s19  }
   0xb   : > { %p526_p5 = por %p34_p2, %p33_p0  ;;  %p530_p6 = por %p40_p4, %p39_p3 }
   0xc   : > { %p105_p7 = scmp.eq.s32.totalorder %s508_s16, 1  ;;  %p111_p8 = scmp.eq.s32.totalorder %s302_s17, 1 }
   0xd   : > { %p330_p10 = scmp.lt.s32.totalorder %s462_s15, 2  ;;  %s137_s26 = sand.u32 1, %s458_s14  }
   0xe   : > { %p537_p11 = por %p105_p7, %p33_p0  ;;  %p541_p12 = por %p111_p8, %p39_p3 }
   0xf   : > { %s316_s27 = sshll.u32 %s462_s15, 9  ;;  %s305_s28 = sshll.u32 %s137_s26, 5 }
  0x10   : > { %s661_s24 = scalar_select %p537_p11, 1, 0 }
  0x11   : > { %s662_s25 = scalar_select %p541_p12, 1, 0 }
  0x12   : > { %s550_s4 = scalar_lea.hbm %s654_s0, %s316_s27  ;;  %s141_s5 = scalar_lea.vmem [#allocation2], %s305_s28 }
  0x13   : > { %s149_s6 = sshll.u32 %s141_s5, 4  ;;  %p554_p13 = pnand %p330_p10, %p526_p5  ;;  %s558_s6 = int_to_ptr.vmem [resolvable:$true] %s149_s6 }
  0x14   : > { %s138_s8 = scalar_lea.sflag [#allocation3], %s137_s26  ;;  %s366_s9 = scalar_lea.hbm %s550_s4, 512 }
  0x15   : > { %p367_p2 = scmp.ne.s32.totalorder %s550_s4, %s366_s9  ;;  %p368_p3 = pneg %p554_p13 }
  0x16   : > { %s371_s17 = scalar_lea.hbm %s654_s0, 1024  ;;  %p372_p5 = scmp.lt.u32.totalorder %s550_s4, %s654_s0 }
  0x17   : > { %p369_p4 = pnand %p368_p3, %p367_p2  ;;  %p373_p8 = scmp.lt.u32.totalorder %s371_s17, %s366_s9 }
  0x18   : > { %p375_p9 = scmp.lt.u32.totalorder %s366_s9, %s550_s4 }
  0x19   : > { %p370_p7 = pneg %p369_p4  ;;  %p374_p10 = por %p373_p8, %p372_p5 }
  0x1b   : > { %p376_p0 = por %p375_p9, %p374_p10 }
  0x1d   : > { %p377_p1 = pnand %p376_p0, %p370_p7 }
  0x1f   : > { %380 = shalt.err (!%p377_p1)
}
  0x20   : > { %s381_s22 = scalar_lea.vmem %s558_s6, 512  ;;  %s464_s26 = smov [#allocation2]  }
  0x21   : > { %p382_p2 = scmp.ne.s32.totalorder %s558_s6, %s381_s22  ;;  %s386_s27 = sshll.u32 %s464_s26, 4  ;;  %s387_s27 = int_to_ptr.vmem [resolvable:$false] %s386_s27 }
  0x22   : > { %s388_s28 = scalar_lea.vmem %s387_s27, 1024  ;;  %p389_p11 = scmp.lt.s32.totalorder %s558_s6, %s387_s27 }
  0x23   : > { %p384_p4 = pnand %p382_p2, %p368_p3  ;;  %p390_p5 = scmp.lt.s32.totalorder %s388_s28, %s381_s22 }
  0x25   : > { %p385_p12 = pneg %p384_p4  ;;  %p391_p8 = por %p390_p5, %p389_p11 }
  0x27   : > { %p392_p9 = pnand %p391_p8, %p385_p12 }
  0x29   : > { %395 = shalt.err (!%p392_p9)
}
  0x2a   : > { %325 = dma.hbm_to_vmem [thread:$0]  (!%p554_p13), %s550_s4, 512, %s558_s6, %s138_s8  }
  0x2b   : > { %p664_p0 = scmp.lt.s32.totalorder %s462_s15, 3  ;;  %p665_p1 = scmp.ge.s32.totalorder %s462_s15, 1 }
  0x2d   : > { %p155_p3 = pnand %p665_p1, %p664_p0 }
  0x2e   : > { %s592_s29 = sand.u32 (!%p155_p3), 1, %s454_s13  }
  0x2f   : > { %158 = sbr.rel (%p155_p3) target bundleno = 206 (0xce), region = 32  ;;  %s309_s30 = sshll.u32 (!%p155_p3), %s592_s29, 5 }
  0x30   : > { %s161_s5 = scalar_lea.sflag (!%p155_p3), [#allocation3], %s592_s29  ;;  %s164_s9 = scalar_lea.vmem (!%p155_p3), [#allocation2], %s309_s30 }
  0x36   : > { %441 = dma.done.wait (%p530_p6), %s161_s5, 512  }
  0x37   : > { %443 = vsyncadd (%p530_p6), %s161_s5, 4294966784  ;;  %v465_v0 = vmov 0   ;;  %v193_v1 = vld [vmem:[%s655_s1] sm:$0x3f]  ;;  %v190_v5 = vld [vmem:[%s164_s9 + $0x8] sm:$0x3f] }
  0x38   : > { %365 = vset.pattern.permute.xlu0 %v465_v0  ;;  %v203_v2 = vld [vmem:[%s656_s2] sm:$0x3f]  ;;  %v191_v6 = vld [vmem:[%s164_s9 + $0x10] sm:$0x3f]  ;;  %v192_v7 = vld [vmem:[%s164_s9 + $0x18] sm:$0x3f] }
  0x39   : > { %196 = vperm.xlu0 %365, %v193_v1   ;;  %v189_v3 = vld [vmem:[%s164_s9] sm:$0x3f]  ;;  %s317_s23 = sshll.u32 %s508_s16, 9  ;;  %s186_s10 = scalar_lea.vmem [#allocation5], %s309_s30 }
  0x3a   : > { %s232_s11 = sshll.u32 %s186_s10, 4  ;;  %s610_s20 = scalar_lea.hbm %s657_s3, %s317_s23  ;;  %s612_s11 = int_to_ptr.vmem [resolvable:$true] %s232_s11 }
  0x3b   : > { %s218_s16 = scalar_lea.sflag [#allocation4], %s592_s29  ;;  %s396_s22 = scalar_lea.vmem %s612_s11, 512 }
  0x3c   : > { %p397_p6 = scmp.ne.s32.totalorder %s612_s11, %s396_s22  ;;  %p666_p11 = scmp.ne.s32.totalorder %s661_s24, 0 }
  0x3d   : > { %206 = vperm.xlu0 %365, %v203_v2   ;;  %s466_s26 = smov [#allocation5]  }
  0x3e   : > { %p398_p12 = pnand %p397_p6, %p666_p11  ;;  %s400_s27 = sshll.u32 %s466_s26, 4  ;;  %s401_s27 = int_to_ptr.vmem [resolvable:$false] %s400_s27 }
  0x3f   : > { %s402_s28 = scalar_lea.vmem %s401_s27, 1024  ;;  %p403_p7 = scmp.lt.s32.totalorder %s612_s11, %s401_s27 }
  0x40   : > { %p399_p13 = pneg %p398_p12  ;;  %p404_p10 = scmp.lt.s32.totalorder %s402_s28, %s396_s22 }
  0x42   : > { %p405_p2 = por %p404_p10, %p403_p7 }
  0x44   : > { %p406_p4 = pnand %p405_p2, %p399_p13 }
  0xb8   : > { %v197_v4 = vpop.permute.xlu0 %196 }
  0xb9   : > { %v199_v8 = vmul.f32 %v197_v4, %v189_v3  ;;  %v200_v9 = vmul.f32 %v197_v4, %v190_v5  ;;  %v201_v10 = vmul.f32 %v197_v4, %v191_v6  ;;  %v202_v11 = vmul.f32 %v197_v4, %v192_v7 }
  0xbc   : > { %v207_v12 = vpop.permute.xlu0 %206 }
  0xbd   : > { %v209_v13 = vadd.f32 %v207_v12, %v199_v8  ;;  %v210_v14 = vadd.f32 %v207_v12, %v200_v9  ;;  %v211_v15 = vadd.f32 %v207_v12, %v201_v10  ;;  %v212_v16 = vadd.f32 %v207_v12, %v202_v11 }
  0xbf   : > { %213 = vst [vmem:[%s186_s10] sm:$0x3f] %v209_v13  ;;  %214 = vst [vmem:[%s186_s10 + $0x8] sm:$0x3f] %v210_v14 }
  0xc0   : > { %215 = vst [vmem:[%s186_s10 + $0x10] sm:$0x3f] %v211_v15  ;;  %216 = vst [vmem:[%s186_s10 + $0x18] sm:$0x3f] %v212_v16 }
  0xc1   : > { %409 = shalt.err (!%p406_p4)
}
  0xc2   : > { %s410_s29 = scalar_lea.hbm %s610_s20, 512  ;;  %s414_s9 = scalar_lea.hbm %s657_s3, 1024 }
  0xc3   : > { %p411_p5 = scmp.ne.s32.totalorder %s610_s20, %s410_s29  ;;  %p415_p0 = scmp.lt.u32.totalorder %s610_s20, %s657_s3 }
  0xc4   : > { %p416_p1 = scmp.lt.u32.totalorder %s414_s9, %s410_s29  ;;  %p418_p6 = scmp.lt.u32.totalorder %s410_s29, %s610_s20 }
  0xc5   : > { %p412_p8 = pnand %p411_p5, %p666_p11 }
  0xc6   : > { %p417_p3 = por %p416_p1, %p415_p0 }
  0xc7   : > { %p413_p9 = pneg %p412_p8 }
  0xc8   : > { %p419_p12 = por %p418_p6, %p417_p3 }
  0xca   : > { %p420_p13 = pnand %p419_p12, %p413_p9 }
  0xcc   : > { %423 = shalt.err (!%p420_p13)
}
  0xcd   : > { %320 = dma.vmem_to_hbm [thread:$0]  (%p666_p11), %s612_s11, 512, %s610_s20, %s218_s16  }
  0xce PF: > { %s244_s7 = sand.u32 1, %s450_s12   ;;  %p667_p7 = scmp.ne.s32.totalorder %s662_s25, 0 }
  0xcf   : > { %p668_p10 = scmp.ge.s32.totalorder %s462_s15, 2  ;;  %s245_s8 = scalar_lea.sflag [#allocation4], %s244_s7 }
  0xd1   : > { %p327_p2 = pnand %p668_p10, %p667_p7 }
  0xd3   : > { %445 = dma.done.wait (!%p327_p2), %s245_s8, 512  }
  0xd4   : > { %447 = vsyncadd (!%p327_p2), %s245_s8, 4294966784  ;;  %p16_p4 = scmp.ge.s32.totalorder %s512_s18, 4   ;;  %s669_s12 = smov %s454_s13 }
  0xd5   : > { %s670_s13 = smov %s458_s14  ;;  %s671_s14 = smov %s524_s21 }
  0xd6   : > { %s672_s15 = smov %s512_s18  ;;  %18 = sbr.rel (!%p16_p4) target bundleno = 5 (0x5), region = 77 }
  0xdd   :  { %250 = vsyncpa [#allocation3], 1 }
  0xde   :  { %252 = vsyncpa [#allocation3 + $0x1], 1 }
  0xdf   :  { %253 = vsyncpa [#allocation4], 1 }
  0xe0   :  { %255 = vsyncpa [#allocation4 + $0x1], 1 }

</bundles_post_ra>
